<compile_context>
chip_gen: v7x
topology: tpu7x:2x2x1
jax: 0.10.0
libtpu: 0.0.40
codegen_flags: <defaults>
</compile_context>

<pallas_src>
import functools

import jax
import jax.numpy as jnp
from jax import lax
from jax.experimental import pallas as pl
from jax.experimental.pallas import tpu as pltpu

EPS = 1e-5
LEAKY_SLOPE = 0.01  # nn.LeakyReLU default negative_slope


def _leaky_relu(x):
    # max(x, a*x) == leaky_relu(x) for 0 < a < 1; cheaper than cmp+select+mul.
    return jnp.maximum(x, LEAKY_SLOPE * x)


def poincare_kernel(x_ref,
                    w1_ref, b1_ref, w2_ref, b2_ref, w3_ref, b3_ref,
                    wf_ref, bf_ref, bp1_ref, wp2_ref, bp2_ref, wp3_ref, bp3_ref,
                    out_ref, *, n_poincare):
    x = x_ref[...]  # (tile_b, n_dim) — lane dim already dense (n_dim=128)

    # --- enc layer 1, computed directly in transposed space: h^T = W1 @ x^T ---
    # NT dot_general: contract W1's last dim with x's last dim -> (n_hidden, tile_b)
    h = _leaky_relu(
        lax.dot_general(w1_ref[...], x, (((1,), (1,)), ((), ())),
                        preferred_element_type=jnp.float32) + b1_ref[...])
    # --- enc layers 2,3: standard (out,in) @ (in, tile_b) matmuls ---
    h = _leaky_relu(jnp.dot(w2_ref[...], h,
                            preferred_element_type=jnp.float32) + b2_ref[...])
    h = _leaky_relu(jnp.dot(w3_ref[...], h,
                            preferred_element_type=jnp.float32) + b3_ref[...])

    # --- fused head: rows = [norm_logit ; direction ; q = Wp1@Wd h + Wp1@bd] ---
    nd = jnp.dot(wf_ref[...], h,
                 preferred_element_type=jnp.float32) + bf_ref[...]
    norm_logit = nd[0:1, :]                       # (1, tile_b)
    direction = nd[1:1 + n_poincare, :]           # (n_poincare, tile_b)
    q = nd[1 + n_poincare:, :]                    # (n_hidden, tile_b)

    # sigmoid via tanh: single EUP op, no f32 divide on the VALU path
    norm = 0.5 * (1.0 + jnp.tanh(0.5 * norm_logit))

    # ||direction||^2 with explicit sublane slices (no cross-lane/sublane reduce)
    d0 = direction[0:1, :]
    ssum = d0 * d0
    for i in range(1, n_poincare):
        di = direction[i:i + 1, :]
        ssum = ssum + di * di

    # direction / clamp(||direction||, eps) * norm == direction * s
    s = norm * lax.rsqrt(jnp.maximum(ssum, EPS * EPS))   # (1, tile_b)
    embedding = direction * s                            # (n_poincare, tile_b)

    # --- pred_head: layer 1 already folded into q (q*s == Wp1 @ emb^T) ---
    p = _leaky_relu(q * s + bp1_ref[...])
    p = _leaky_relu(jnp.dot(wp2_ref[...], p,
                            preferred_element_type=jnp.float32) + bp2_ref[...])
    pred = jnp.dot(wp3_ref[...], p,
                   preferred_element_type=jnp.float32) + bp3_ref[...]   # (1, tile_b)

    # Lane-dense transposed output slab: [embedding ; pred] -> (n_poincare+1, tile_b)
    out_ref[0:n_poincare, :] = embedding
    out_ref[n_poincare:, :] = pred


def _round_up(a, m):
    return ((a + m - 1) // m) * m


def poincare_embed_forward(x, params, *, max_tile_b=4096):
    """x: (B, n_dim) float32. params from init_params (PyTorch (out,in) layout).

    Returns (embedding (B, n_poincare), pred (B, 1))."""
    B, n_dim = x.shape
    n_hidden = params["w1"].shape[0]
    n_poincare = params["wd"].shape[0]
    n_out = n_poincare + 1

    # Fused head: [Wn ; Wd ; Wp1@Wd] with bias [bn ; bd ; Wp1@bd].
    wf = jnp.concatenate([params["wn"], params["wd"],
                          params["wp1"] @ params["wd"]], axis=0)
    bf = jnp.concatenate([params["bn"], params["bd"],
                          params["wp1"] @ params["bd"]], axis=0)

    # Batch tiles: lane-sized multiples of 128; >=2 tiles when B is big enough so
    # v7x's two TensorCores both get work; balanced to minimize padding.
    n_tiles = pl.cdiv(B, max_tile_b)
    if B >= 1024:
        n_tiles = max(n_tiles, 2)
    tile_b = _round_up(pl.cdiv(B, n_tiles), 128)
    grid = pl.cdiv(B, tile_b)
    b_pad = grid * tile_b
    if b_pad != B:
        x = jnp.pad(x, ((0, b_pad - B), (0, 0)))

    weights = (params["w1"], params["b1"], params["w2"], params["b2"],
               params["w3"], params["b3"], wf, bf, params["bp1"],
               params["wp2"], params["bp2"], params["wp3"], params["bp3"])

    def resident(w):
        # Full-array block, constant index map: stays VMEM-resident across steps.
        return pl.BlockSpec(w.shape, lambda i: (0, 0))

    flops = 2 * b_pad * (n_dim * n_hidden                       # enc layer 1
                         + 2 * n_hidden * n_hidden              # enc layers 2,3
                         + n_hidden * (1 + n_poincare + n_hidden)  # fused head
                         + n_hidden * n_hidden                  # pred layer 2
                         + n_hidden)                            # pred layer 3
    bytes_accessed = (b_pad * (n_dim + n_out) * 4
                      + sum(int(w.size) * 4 for w in weights))

    kernel = functools.partial(poincare_kernel, n_poincare=n_poincare)

    out = pl.pallas_call(
        kernel,
        out_shape=jax.ShapeDtypeStruct((n_out, b_pad), jnp.float32),
        grid=(grid,),
        in_specs=[pl.BlockSpec((tile_b, n_dim), lambda i: (i, 0))]
                 + [resident(w) for w in weights],
        out_specs=pl.BlockSpec((n_out, tile_b), lambda i: (0, i)),
        compiler_params=pltpu.CompilerParams(
            dimension_semantics=("parallel",),
            vmem_limit_bytes=32 * 1024 * 1024),
        cost_estimate=pl.CostEstimate(
            flops=flops,
            transcendentals=2 * b_pad,   # tanh + rsqrt per row
            bytes_accessed=bytes_accessed),
    )(x, *weights)

    embedding = out[:n_poincare, :B].T    # tiny (n_poincare, B) transpose in wrapper
    pred = out[n_poincare:, :B].T
    return embedding, pred


def init_params(key, n_dim=128, n_hidden=32, n_poincare=2):
    """PyTorch-Linear-style init; weights (out_features, in_features), biases (out, 1)."""
    def linear(key, fan_in, fan_out):
        kw, kb = jax.random.split(key)
        bound = 1.0 / jnp.sqrt(float(fan_in))
        w = jax.random.uniform(kw, (fan_out, fan_in), jnp.float32, -bound, bound)
        b = jax.random.uniform(kb, (fan_out, 1), jnp.float32, -bound, bound)
        return w, b

    keys = jax.random.split(key, 8)
    p = {}
    p["w1"], p["b1"] = linear(keys[0], n_dim, n_hidden)
    p["w2"], p["b2"] = linear(keys[1], n_hidden, n_hidden)
    p["w3"], p["b3"] = linear(keys[2], n_hidden, n_hidden)
    p["wn"], p["bn"] = linear(keys[3], n_hidden, 1)
    p["wd"], p["bd"] = linear(keys[4], n_hidden, n_poincare)
    p["wp1"], p["bp1"] = linear(keys[5], n_poincare, n_hidden)
    p["wp2"], p["bp2"] = linear(keys[6], n_hidden, n_hidden)
    p["wp3"], p["bp3"] = linear(keys[7], n_hidden, 1)
    return p


def reference_forward(x, p):
    """Pure-JAX reference matching the PyTorch module (row-major math)."""
    def lin(v, w, b):
        return v @ w.T + b.T

    def lrelu(v):
        return jnp.where(v > 0, v, LEAKY_SLOPE * v)

    h = lrelu(lin(x, p["w1"], p["b1"]))
    h = lrelu(lin(h, p["w2"], p["b2"]))
    h = lrelu(lin(h, p["w3"], p["b3"]))
    norm = jax.nn.sigmoid(lin(h, p["wn"], p["bn"]))
    direction = lin(h, p["wd"], p["bd"])
    dnorm = jnp.maximum(jnp.linalg.norm(direction, axis=-1, keepdims=True), EPS)
    emb = direction / dnorm * norm
    q = lrelu(lin(emb, p["wp1"], p["bp1"]))
    q = lrelu(lin(q, p["wp2"], p["bp2"]))
    pred = lin(q, p["wp3"], p["bp3"])
    return emb, pred


if __name__ == "__main__":
    key = jax.random.PRNGKey(0)
    k_x, k_p = jax.random.split(key)

    B, N_DIM, N_HIDDEN, N_POINCARE = 8, 128, 32, 2
    x = jax.random.normal(k_x, (B, N_DIM), dtype=jnp.float32)
    params = init_params(k_p, N_DIM, N_HIDDEN, N_POINCARE)

    emb, pred = poincare_embed_forward(x, params)
    emb = jax.block_until_ready(emb)
    pred = jax.block_until_ready(pred)

    emb_ref, pred_ref = reference_forward(x, params)
    assert emb.shape == (B, N_POINCARE) and pred.shape == (B, 1)
    assert jnp.allclose(emb, emb_ref, rtol=1e-4, atol=1e-5)
    assert jnp.allclose(pred, pred_ref, rtol=1e-4, atol=1e-5)

    print("KERNEL_OK")
</pallas_src>

<mosaic_0001>
module attributes {stable_mosaic.version = 11 : i64} {
  func.func @poincare_kernel(%arg0: i32, %arg1: memref<128x128xf32, #tpu.memory_space<vmem>>, %arg2: memref<32x128xf32, #tpu.memory_space<vmem>>, %arg3: memref<32x1xf32, #tpu.memory_space<vmem>>, %arg4: memref<32x32xf32, #tpu.memory_space<vmem>>, %arg5: memref<32x1xf32, #tpu.memory_space<vmem>>, %arg6: memref<32x32xf32, #tpu.memory_space<vmem>>, %arg7: memref<32x1xf32, #tpu.memory_space<vmem>>, %arg8: memref<35x32xf32, #tpu.memory_space<vmem>>, %arg9: memref<35x1xf32, #tpu.memory_space<vmem>>, %arg10: memref<32x1xf32, #tpu.memory_space<vmem>>, %arg11: memref<32x32xf32, #tpu.memory_space<vmem>>, %arg12: memref<32x1xf32, #tpu.memory_space<vmem>>, %arg13: memref<1x32xf32, #tpu.memory_space<vmem>>, %arg14: memref<1x1xf32, #tpu.memory_space<vmem>>, %arg15: memref<3x128xf32, #tpu.memory_space<vmem>>) attributes {dimension_semantics = [#tpu.dimension_semantics<parallel>], iteration_bounds = array<i64: 1>, scalar_prefetch = 0 : i64, scratch_operands = 0 : i64, tpu.core_type = #tpu.core_type<tc>, window_params = [{transform_indices = @transform_0, window_bounds = array<i64: 128, 128>}, {pipeline_mode = #tpu.pipeline_mode<synchronous>, transform_indices = @transform_1, window_bounds = array<i64: 32, 128>}, {pipeline_mode = #tpu.pipeline_mode<synchronous>, transform_indices = @transform_2, window_bounds = array<i64: 32, 1>}, {pipeline_mode = #tpu.pipeline_mode<synchronous>, transform_indices = @transform_3, window_bounds = array<i64: 32, 32>}, {pipeline_mode = #tpu.pipeline_mode<synchronous>, transform_indices = @transform_4, window_bounds = array<i64: 32, 1>}, {pipeline_mode = #tpu.pipeline_mode<synchronous>, transform_indices = @transform_5, window_bounds = array<i64: 32, 32>}, {pipeline_mode = #tpu.pipeline_mode<synchronous>, transform_indices = @transform_6, window_bounds = array<i64: 32, 1>}, {pipeline_mode = #tpu.pipeline_mode<synchronous>, transform_indices = @transform_7, window_bounds = array<i64: 35, 32>}, {pipeline_mode = #tpu.pipeline_mode<synchronous>, transform_indices = @transform_8, window_bounds = array<i64: 35, 1>}, {pipeline_mode = #tpu.pipeline_mode<synchronous>, transform_indices = @transform_9, window_bounds = array<i64: 32, 1>}, {pipeline_mode = #tpu.pipeline_mode<synchronous>, transform_indices = @transform_10, window_bounds = array<i64: 32, 32>}, {pipeline_mode = #tpu.pipeline_mode<synchronous>, transform_indices = @transform_11, window_bounds = array<i64: 32, 1>}, {pipeline_mode = #tpu.pipeline_mode<synchronous>, transform_indices = @transform_12, window_bounds = array<i64: 1, 32>}, {pipeline_mode = #tpu.pipeline_mode<synchronous>, transform_indices = @transform_13, window_bounds = array<i64: 1, 1>}, {transform_indices = @transform_14, window_bounds = array<i64: 3, 128>}]} {
    %c0 = arith.constant 0 : index
    %c0_0 = arith.constant 0 : index
    %0 = vector.load %arg1[%c0, %c0_0] : memref<128x128xf32, #tpu.memory_space<vmem>>, vector<128x128xf32>
    %c0_1 = arith.constant 0 : index
    %c0_2 = arith.constant 0 : index
    %1 = vector.load %arg2[%c0_1, %c0_2] : memref<32x128xf32, #tpu.memory_space<vmem>>, vector<32x128xf32>
    %cst = arith.constant dense<0.000000e+00> : vector<32x128xf32>
    %2 = tpu.matmul %1, %0, %cst {dimension_numbers = #tpu.dot_dimension_numbers<[1], [1], [0], [0], [0, 0, 1, 0], [], []>} : vector<32x128xf32>, vector<128x128xf32>, vector<32x128xf32> -> vector<32x128xf32>
    %c0_3 = arith.constant 0 : index
    %c0_4 = arith.constant 0 : index
    %3 = vector.load %arg3[%c0_3, %c0_4] : memref<32x1xf32, #tpu.memory_space<vmem>>, vector<32x1xf32>
    %4 = vector.broadcast %3 : vector<32x1xf32> to vector<32x128xf32>
    %5 = arith.addf %2, %4 : vector<32x128xf32>
    %cst_5 = arith.constant 0.00999999977 : f32
    %6 = vector.broadcast %cst_5 : f32 to vector<32x128xf32>
    %7 = arith.mulf %6, %5 : vector<32x128xf32>
    %8 = arith.maximumf %5, %7 : vector<32x128xf32>
    %c0_6 = arith.constant 0 : index
    %c0_7 = arith.constant 0 : index
    %9 = vector.load %arg4[%c0_6, %c0_7] : memref<32x32xf32, #tpu.memory_space<vmem>>, vector<32x32xf32>
    %cst_8 = arith.constant dense<0.000000e+00> : vector<32x128xf32>
    %10 = tpu.matmul %9, %8, %cst_8 {dimension_numbers = #tpu.dot_dimension_numbers<[1], [0], [0], [1], [0, 0, 1, 1], [], []>} : vector<32x32xf32>, vector<32x128xf32>, vector<32x128xf32> -> vector<32x128xf32>
    %c0_9 = arith.constant 0 : index
    %c0_10 = arith.constant 0 : index
    %11 = vector.load %arg5[%c0_9, %c0_10] : memref<32x1xf32, #tpu.memory_space<vmem>>, vector<32x1xf32>
    %12 = vector.broadcast %11 : vector<32x1xf32> to vector<32x128xf32>
    %13 = arith.addf %10, %12 : vector<32x128xf32>
    %cst_11 = arith.constant 0.00999999977 : f32
    %14 = vector.broadcast %cst_11 : f32 to vector<32x128xf32>
    %15 = arith.mulf %14, %13 : vector<32x128xf32>
    %16 = arith.maximumf %13, %15 : vector<32x128xf32>
    %c0_12 = arith.constant 0 : index
    %c0_13 = arith.constant 0 : index
    %17 = vector.load %arg6[%c0_12, %c0_13] : memref<32x32xf32, #tpu.memory_space<vmem>>, vector<32x32xf32>
    %cst_14 = arith.constant dense<0.000000e+00> : vector<32x128xf32>
    %18 = tpu.matmul %17, %16, %cst_14 {dimension_numbers = #tpu.dot_dimension_numbers<[1], [0], [0], [1], [0, 0, 1, 1], [], []>} : vector<32x32xf32>, vector<32x128xf32>, vector<32x128xf32> -> vector<32x128xf32>
    %c0_15 = arith.constant 0 : index
    %c0_16 = arith.constant 0 : index
    %19 = vector.load %arg7[%c0_15, %c0_16] : memref<32x1xf32, #tpu.memory_space<vmem>>, vector<32x1xf32>
    %20 = vector.broadcast %19 : vector<32x1xf32> to vector<32x128xf32>
    %21 = arith.addf %18, %20 : vector<32x128xf32>
    %cst_17 = arith.constant 0.00999999977 : f32
    %22 = vector.broadcast %cst_17 : f32 to vector<32x128xf32>
    %23 = arith.mulf %22, %21 : vector<32x128xf32>
    %24 = arith.maximumf %21, %23 : vector<32x128xf32>
    %c0_18 = arith.constant 0 : index
    %c0_19 = arith.constant 0 : index
    %25 = vector.load %arg8[%c0_18, %c0_19] : memref<35x32xf32, #tpu.memory_space<vmem>>, vector<35x32xf32>
    %cst_20 = arith.constant dense<0.000000e+00> : vector<35x128xf32>
    %26 = tpu.matmul %25, %24, %cst_20 {dimension_numbers = #tpu.dot_dimension_numbers<[1], [0], [0], [1], [0, 0, 1, 1], [], []>} : vector<35x32xf32>, vector<32x128xf32>, vector<35x128xf32> -> vector<35x128xf32>
    %c0_21 = arith.constant 0 : index
    %c0_22 = arith.constant 0 : index
    %27 = vector.load %arg9[%c0_21, %c0_22] : memref<35x1xf32, #tpu.memory_space<vmem>>, vector<35x1xf32>
    %28 = vector.broadcast %27 : vector<35x1xf32> to vector<35x128xf32>
    %29 = arith.addf %26, %28 : vector<35x128xf32>
    %30 = vector.extract_strided_slice %29 {offsets = [0, 0], sizes = [1, 128], strides = [1, 1]} : vector<35x128xf32> to vector<1x128xf32>
    %31 = vector.extract_strided_slice %29 {offsets = [1, 0], sizes = [2, 128], strides = [1, 1]} : vector<35x128xf32> to vector<2x128xf32>
    %32 = vector.extract_strided_slice %29 {offsets = [3, 0], sizes = [32, 128], strides = [1, 1]} : vector<35x128xf32> to vector<32x128xf32>
    %cst_23 = arith.constant 5.000000e-01 : f32
    %33 = vector.broadcast %cst_23 : f32 to vector<1x128xf32>
    %34 = arith.mulf %33, %30 : vector<1x128xf32>
    %35 = math.tanh %34 : vector<1x128xf32>
    %cst_24 = arith.constant 1.000000e+00 : f32
    %36 = vector.broadcast %cst_24 : f32 to vector<1x128xf32>
    %37 = arith.addf %36, %35 : vector<1x128xf32>
    %cst_25 = arith.constant 5.000000e-01 : f32
    %38 = vector.broadcast %cst_25 : f32 to vector<1x128xf32>
    %39 = arith.mulf %38, %37 : vector<1x128xf32>
    %40 = vector.extract_strided_slice %31 {offsets = [0, 0], sizes = [1, 128], strides = [1, 1]} : vector<2x128xf32> to vector<1x128xf32>
    %41 = arith.mulf %40, %40 : vector<1x128xf32>
    %42 = vector.extract_strided_slice %31 {offsets = [1, 0], sizes = [1, 128], strides = [1, 1]} : vector<2x128xf32> to vector<1x128xf32>
    %43 = arith.mulf %42, %42 : vector<1x128xf32>
    %44 = arith.addf %41, %43 : vector<1x128xf32>
    %cst_26 = arith.constant 1.000000e-10 : f32
    %45 = vector.broadcast %cst_26 : f32 to vector<1x128xf32>
    %46 = arith.maximumf %44, %45 : vector<1x128xf32>
    %47 = math.rsqrt %46 : vector<1x128xf32>
    %48 = arith.mulf %39, %47 : vector<1x128xf32>
    %49 = vector.broadcast %48 : vector<1x128xf32> to vector<2x128xf32>
    %50 = arith.mulf %31, %49 : vector<2x128xf32>
    %51 = vector.broadcast %48 : vector<1x128xf32> to vector<32x128xf32>
    %52 = arith.mulf %32, %51 : vector<32x128xf32>
    %c0_27 = arith.constant 0 : index
    %c0_28 = arith.constant 0 : index
    %53 = vector.load %arg10[%c0_27, %c0_28] : memref<32x1xf32, #tpu.memory_space<vmem>>, vector<32x1xf32>
    %54 = vector.broadcast %53 : vector<32x1xf32> to vector<32x128xf32>
    %55 = arith.addf %52, %54 : vector<32x128xf32>
    %cst_29 = arith.constant 0.00999999977 : f32
    %56 = vector.broadcast %cst_29 : f32 to vector<32x128xf32>
    %57 = arith.mulf %56, %55 : vector<32x128xf32>
    %58 = arith.maximumf %55, %57 : vector<32x128xf32>
    %c0_30 = arith.constant 0 : index
    %c0_31 = arith.constant 0 : index
    %59 = vector.load %arg11[%c0_30, %c0_31] : memref<32x32xf32, #tpu.memory_space<vmem>>, vector<32x32xf32>
    %cst_32 = arith.constant dense<0.000000e+00> : vector<32x128xf32>
    %60 = tpu.matmul %59, %58, %cst_32 {dimension_numbers = #tpu.dot_dimension_numbers<[1], [0], [0], [1], [0, 0, 1, 1], [], []>} : vector<32x32xf32>, vector<32x128xf32>, vector<32x128xf32> -> vector<32x128xf32>
    %c0_33 = arith.constant 0 : index
    %c0_34 = arith.constant 0 : index
    %61 = vector.load %arg12[%c0_33, %c0_34] : memref<32x1xf32, #tpu.memory_space<vmem>>, vector<32x1xf32>
    %62 = vector.broadcast %61 : vector<32x1xf32> to vector<32x128xf32>
    %63 = arith.addf %60, %62 : vector<32x128xf32>
    %cst_35 = arith.constant 0.00999999977 : f32
    %64 = vector.broadcast %cst_35 : f32 to vector<32x128xf32>
    %65 = arith.mulf %64, %63 : vector<32x128xf32>
    %66 = arith.maximumf %63, %65 : vector<32x128xf32>
    %c0_36 = arith.constant 0 : index
    %c0_37 = arith.constant 0 : index
    %67 = vector.load %arg13[%c0_36, %c0_37] : memref<1x32xf32, #tpu.memory_space<vmem>>, vector<1x32xf32>
    %cst_38 = arith.constant dense<0.000000e+00> : vector<1x128xf32>
    %68 = tpu.matmul %67, %66, %cst_38 {dimension_numbers = #tpu.dot_dimension_numbers<[1], [0], [0], [1], [0, 0, 1, 1], [], []>} : vector<1x32xf32>, vector<32x128xf32>, vector<1x128xf32> -> vector<1x128xf32>
    %c0_39 = arith.constant 0 : index
    %c0_40 = arith.constant 0 : index
    %69 = vector.load %arg14[%c0_39, %c0_40] : memref<1x1xf32, #tpu.memory_space<vmem>>, vector<1x1xf32>
    %70 = vector.broadcast %69 : vector<1x1xf32> to vector<1x128xf32>
    %71 = arith.addf %68, %70 : vector<1x128xf32>
    %c0_41 = arith.constant 0 : index
    %c0_42 = arith.constant 0 : index
    %72 = vector.load %arg15[%c0_41, %c0_42] : memref<3x128xf32, #tpu.memory_space<vmem>>, vector<2x128xf32>
    tpu.vector_store %arg15[%c0_41, %c0_42], %50 {strides = array<i32>} : memref<3x128xf32, #tpu.memory_space<vmem>>, vector<2x128xf32>,
    %c2 = arith.constant 2 : index
    %c0_43 = arith.constant 0 : index
    %73 = vector.load %arg15[%c2, %c0_43] : memref<3x128xf32, #tpu.memory_space<vmem>>, vector<1x128xf32>
    tpu.vector_store %arg15[%c2, %c0_43], %71 {strides = array<i32>} : memref<3x128xf32, #tpu.memory_space<vmem>>, vector<1x128xf32>,
    return
  }
  func.func @transform_0(%arg0: i32) -> (i32, i32) {
    %c0_i32 = arith.constant 0 : i32
    %c0_i32_0 = arith.constant 0 : i32
    return %arg0, %c0_i32 : i32, i32
  }
  func.func @transform_1(%arg0: i32) -> (i32, i32) {
    %c0_i32 = arith.constant 0 : i32
    %c0_i32_0 = arith.constant 0 : i32
    %c0_i32_1 = arith.constant 0 : i32
    return %c0_i32, %c0_i32_0 : i32, i32
  }
  func.func @transform_2(%arg0: i32) -> (i32, i32) {
    %c0_i32 = arith.constant 0 : i32
    %c0_i32_0 = arith.constant 0 : i32
    %c0_i32_1 = arith.constant 0 : i32
    return %c0_i32, %c0_i32_0 : i32, i32
  }
  func.func @transform_3(%arg0: i32) -> (i32, i32) {
    %c0_i32 = arith.constant 0 : i32
    %c0_i32_0 = arith.constant 0 : i32
    %c0_i32_1 = arith.constant 0 : i32
    return %c0_i32, %c0_i32_0 : i32, i32
  }
  func.func @transform_4(%arg0: i32) -> (i32, i32) {
    %c0_i32 = arith.constant 0 : i32
    %c0_i32_0 = arith.constant 0 : i32
    %c0_i32_1 = arith.constant 0 : i32
    return %c0_i32, %c0_i32_0 : i32, i32
  }
  func.func @transform_5(%arg0: i32) -> (i32, i32) {
    %c0_i32 = arith.constant 0 : i32
    %c0_i32_0 = arith.constant 0 : i32
    %c0_i32_1 = arith.constant 0 : i32
    return %c0_i32, %c0_i32_0 : i32, i32
  }
  func.func @transform_6(%arg0: i32) -> (i32, i32) {
    %c0_i32 = arith.constant 0 : i32
    %c0_i32_0 = arith.constant 0 : i32
    %c0_i32_1 = arith.constant 0 : i32
    return %c0_i32, %c0_i32_0 : i32, i32
  }
  func.func @transform_7(%arg0: i32) -> (i32, i32) {
    %c0_i32 = arith.constant 0 : i32
    %c0_i32_0 = arith.constant 0 : i32
    %c0_i32_1 = arith.constant 0 : i32
    return %c0_i32, %c0_i32_0 : i32, i32
  }
  func.func @transform_8(%arg0: i32) -> (i32, i32) {
    %c0_i32 = arith.constant 0 : i32
    %c0_i32_0 = arith.constant 0 : i32
    %c0_i32_1 = arith.constant 0 : i32
    return %c0_i32, %c0_i32_0 : i32, i32
  }
  func.func @transform_9(%arg0: i32) -> (i32, i32) {
    %c0_i32 = arith.constant 0 : i32
    %c0_i32_0 = arith.constant 0 : i32
    %c0_i32_1 = arith.constant 0 : i32
    return %c0_i32, %c0_i32_0 : i32, i32
  }
  func.func @transform_10(%arg0: i32) -> (i32, i32) {
    %c0_i32 = arith.constant 0 : i32
    %c0_i32_0 = arith.constant 0 : i32
    %c0_i32_1 = arith.constant 0 : i32
    return %c0_i32, %c0_i32_0 : i32, i32
  }
  func.func @transform_11(%arg0: i32) -> (i32, i32) {
    %c0_i32 = arith.constant 0 : i32
    %c0_i32_0 = arith.constant 0 : i32
    %c0_i32_1 = arith.constant 0 : i32
    return %c0_i32, %c0_i32_0 : i32, i32
  }
  func.func @transform_12(%arg0: i32) -> (i32, i32) {
    %c0_i32 = arith.constant 0 : i32
    %c0_i32_0 = arith.constant 0 : i32
    %c0_i32_1 = arith.constant 0 : i32
    return %c0_i32, %c0_i32_0 : i32, i32
  }
  func.func @transform_13(%arg0: i32) -> (i32, i32) {
    %c0_i32 = arith.constant 0 : i32
    %c0_i32_0 = arith.constant 0 : i32
    %c0_i32_1 = arith.constant 0 : i32
    return %c0_i32, %c0_i32_0 : i32, i32
  }
  func.func @transform_14(%arg0: i32) -> (i32, i32) {
    %c0_i32 = arith.constant 0 : i32
    %c0_i32_0 = arith.constant 0 : i32
    return %c0_i32, %arg0 : i32, i32
  }
}

</mosaic_0001>

<bundles_post_ra>
// kernel: tpu_custom_call.1
= control target key start
LH: loop header
LB: loop body
LE: loop exit
PB: predicated region body
PF: predicated region fallthrough
CT: control target
= control target key end

     0   :  { %s1539_s0 = inlined_call_operand.vmem [shape: f32[128,128], index: 0, kind: input, shape index: {}]   ;;  %s1540_s1 = inlined_call_operand.vmem [shape: f32[32,128], index: 1, kind: input, shape index: {}]   ;;  %s1541_s2 = inlined_call_operand.vmem [shape: f32[32,1], index: 2, kind: input, shape index: {}]   ;;  %s1542_s3 = inlined_call_operand.vmem [shape: f32[32,32], index: 3, kind: input, shape index: {}]   ;;  %s1543_s4 = inlined_call_operand.vmem [shape: f32[32,1], index: 4, kind: input, shape index: {}]   ;;  %s1544_s5 = inlined_call_operand.vmem [shape: f32[32,32], index: 5, kind: input, shape index: {}]   ;;  %s1545_s6 = inlined_call_operand.vmem [shape: f32[32,1], index: 6, kind: input, shape index: {}]   ;;  %s1546_s7 = inlined_call_operand.vmem [shape: f32[35,32], index: 7, kind: input, shape index: {}]   ;;  %s1547_s8 = inlined_call_operand.vmem [shape: f32[35,1], index: 8, kind: input, shape index: {}]   ;;  %s1548_s9 = inlined_call_operand.vmem [shape: f32[32,1], index: 9, kind: input, shape index: {}]   ;;  %s1549_s10 = inlined_call_operand.vmem [shape: f32[32,32], index: 10, kind: input, shape index: {}]   ;;  %s1550_s11 = inlined_call_operand.vmem [shape: f32[32,1], index: 11, kind: input, shape index: {}]   ;;  %s1551_s12 = inlined_call_operand.vmem [shape: f32[1,32], index: 12, kind: input, shape index: {}]   ;;  %s1552_s13 = inlined_call_operand.<no memory space> [shape: f32[1,1], index: 13, kind: input, shape index: {}]   ;;  %s1553_s14 = inlined_call_operand.hbm [shape: f32[3,128], index: 14, kind: output, shape index: {}]  }
   0x1   :  { %v19_v0 = vstv %s1552_s13 }
   0x2   :  { %20 = vst [vmem:[#allocation2] sm:$0x1] %v19_v0 }
   0x3   :  { %v50_v1 = vld [vmem:[%s1539_s0] sm:$0xff]  ;;  %v51_v2 = vld [vmem:[%s1539_s0 + $0x8] sm:$0xff]  ;;  %v52_v3 = vld [vmem:[%s1539_s0 + $0x10] sm:$0xff]  ;;  %v1211_v6 = vmov 0  }
   0x4   :  { %v1108_v4 = vpack.c.bf16 %v51_v2, %v50_v1  ;;  %v53_v5 = vld [vmem:[%s1539_s0 + $0x18] sm:$0xff]  ;;  %1181 = vset.pattern.permute.xlu0 %v1211_v6  ;;  %1182 = vset.pattern.permute.xlu1 %v1211_v6  ;;  %v66_v8 = vld [vmem:[%s1540_s1] sm:$0xff]  ;;  %v55_v10 = vld [vmem:[%s1539_s0 + $0x28] sm:$0xff] }
   0x5   :  { %v1112_v7 = vpack.c.bf16 %v53_v5, %v52_v3  ;;  %v54_v9 = vld [vmem:[%s1539_s0 + $0x20] sm:$0xff]  ;;  %1026 = vmatprep.mubr.f32.mxu0 %v66_v8  ;;  %v72_v12 = vld [vmem:[%s1541_s2 + $0x10] sm:$0xff]  ;;  %v71_v13 = vld [vmem:[%s1541_s2 + $0x8] sm:$0xff] }
   0x6   :  { %1109 = vmatprep.subr.bf16.mxu0 %v1108_v4  ;;  %v70_v11 = vld [vmem:[%s1541_s2] sm:$0xff]  ;;  %86 = vperm.xlu1 %1182, %v72_v12   ;;  %v1116_v14 = vpack.c.bf16 %v55_v10, %v54_v9  ;;  %v73_v15 = vld [vmem:[%s1541_s2 + $0x18] sm:$0xff]  ;;  %v192_v17 = vld [vmem:[%s1543_s4 + $0x8] sm:$0xff] }
   0x7   :  { %1111 = vmatpush3.bf16.xpose.msra.mxu0 %v1108_v4  ;;  %76 = vperm.xlu0 %1181, %v70_v11   ;;  %v191_v16 = vld [vmem:[%s1543_s4] sm:$0xff]  ;;  %v56_v18 = vld [vmem:[%s1539_s0 + $0x30] sm:$0xff]  ;;  %v57_v19 = vld [vmem:[%s1539_s0 + $0x38] sm:$0xff] }
   0x8   :  { %1113 = vmatprep.subr.bf16.mxu0 %v1112_v7 }
   0xa   :  { %91 = vperm.xlu1 %1182, %v73_v15  }
   0xb   :  { %81 = vperm.xlu0 %1181, %v71_v13  }
   0xf   :  { %1115 = vmatpush3.bf16.xpose.msra.mxu0 %v1112_v7  ;;  %197 = vperm.xlu0 %1181, %v191_v16  }
  0x10   :  { %1117 = vmatprep.subr.bf16.mxu0 %v1116_v14 }
  0x11   :  { %21 = vsyncpa [#allocation4], 0  ;;  %202 = vperm.xlu1 %1182, %v192_v17   ;;  %v193_v20 = vld [vmem:[%s1543_s4 + $0x10] sm:$0xff]  ;;  %v1120_v21 = vpack.c.bf16 %v57_v19, %v56_v18  ;;  %v194_v22 = vld [vmem:[%s1543_s4 + $0x18] sm:$0xff]  ;;  %vm215_vm0 = vcmask 261120   ;;  %vm1213_vm1 = vmmov 0  }
  0x12   :  { %v325_v23 = vld [vmem:[%s1545_s6] sm:$0xff]  ;;  %v326_v24 = vld [vmem:[%s1545_s6 + $0x8] sm:$0xff]  ;;  %v327_v27 = vld [vmem:[%s1545_s6 + $0x10] sm:$0xff]  ;;  %vm638_vm2 = vcmask 1042432   ;;  %vm699_vm3 = vcmask 1044480   ;;  %s1215_s29 = smov [#allocation3]  }
  0x13   :  { %207 = vperm.xlu0 %1181, %v193_v20   ;;  %v58_v25 = vld [vmem:[%s1539_s0 + $0x40] sm:$0xff]  ;;  %v59_v26 = vld [vmem:[%s1539_s0 + $0x48] sm:$0xff]  ;;  %v328_v29 = vld [vmem:[%s1545_s6 + $0x18] sm:$0xff]  ;;  %s910_s30 = sshll.u32 %s1215_s29, 4  ;;  %s911_s30 = int_to_ptr.vmem [resolvable:$true] %s910_s30 }
  0x14   :  { %v1124_v28 = vpack.c.bf16 %v59_v26, %v58_v25  ;;  %v459_v30 = vld [vmem:[%s1547_s8] sm:$0xff]  ;;  %v460_v31 = vld [vmem:[%s1547_s8 + $0x8] sm:$0xff]  ;;  %v60_v32 = vld [vmem:[%s1539_s0 + $0x50] sm:$0xff]  ;;  %s1187_s6 = scalar_lea.vmem %s911_s30, 64  ;;  %p1192_p1 = scmp.lt.s32.totalorder %s911_s30, %s911_s30 }
  0x15   :  { %212 = vperm.xlu1 %1182, %v194_v22   ;;  %v61_v33 = vld [vmem:[%s1539_s0 + $0x58] sm:$0xff]  ;;  %v461_v34 = vld [vmem:[%s1547_s8 + $0x10] sm:$0xff]  ;;  %v618_v36 = vld [vmem:[%s1548_s9] sm:$0xff]  ;;  %p1188_p0 = scmp.ne.s32.totalorder %s911_s30, %s1187_s6  ;;  %p1193_p2 = scmp.lt.s32.totalorder %s1187_s6, %s1187_s6 }
  0x16   :  { %v1128_v35 = vpack.c.bf16 %v61_v33, %v60_v32  ;;  %v619_v37 = vld [vmem:[%s1548_s9 + $0x8] sm:$0xff]  ;;  %v620_v38 = vld [vmem:[%s1548_s9 + $0x10] sm:$0xff]  ;;  %v62_v39 = vld [vmem:[%s1539_s0 + $0x60] sm:$0xff] }
  0x17   :  { %1119 = vmatpush3.bf16.xpose.msra.mxu0 %v1116_v14  ;;  %331 = vperm.xlu0 %1181, %v325_v23   ;;  %v63_v40 = vld [vmem:[%s1539_s0 + $0x68] sm:$0xff]  ;;  %v462_v41 = vld [vmem:[%s1547_s8 + $0x18] sm:$0xff]  ;;  %v463_v43 = vld [vmem:[%s1547_s8 + $0x20] sm:$0x7]  ;;  %p1194_p3 = por %p1193_p2, %p1192_p1 }
  0x18   :  { %1121 = vmatprep.subr.bf16.mxu0 %v1120_v21  ;;  %v1132_v42 = vpack.c.bf16 %v63_v40, %v62_v39  ;;  %v621_v44 = vld [vmem:[%s1548_s9 + $0x18] sm:$0xff]  ;;  %v670_v45 = vld [vmem:[%s1550_s11] sm:$0xff]  ;;  %v64_v46 = vld [vmem:[%s1539_s0 + $0x70] sm:$0xff] }
  0x19   :  { %336 = vperm.xlu1 %1182, %v326_v24   ;;  %v65_v47 = vld [vmem:[%s1539_s0 + $0x78] sm:$0xff]  ;;  %v671_v48 = vld [vmem:[%s1550_s11 + $0x8] sm:$0xff]  ;;  %v672_v50 = vld [vmem:[%s1550_s11 + $0x10] sm:$0xff]  ;;  %p1195_p4 = pnand %p1194_p3, %p1188_p0 }
  0x1a   :  { %v1136_v49 = vpack.c.bf16 %v65_v47, %v64_v46  ;;  %v673_v51 = vld [vmem:[%s1550_s11 + $0x18] sm:$0xff]  ;;  %v819_v52 = vld [vmem:[#allocation2] sm:$0x1]  ;;  %v67_v53 = vld [vmem:[%s1540_s1 + $0x8] sm:$0xff] }
  0x1b   :  { %341 = vperm.xlu0 %1181, %v327_v27   ;;  %v68_v54 = vld [vmem:[%s1540_s1 + $0x10] sm:$0xff]  ;;  %v69_v55 = vld [vmem:[%s1540_s1 + $0x18] sm:$0xff]  ;;  %v187_v56 = vld [vmem:[%s1542_s3] sm:$0xff] }
  0x1c   :  { %1040 = vmatprep.mubr.msk.f32.mxu1 %vm215_vm0, %v187_v56  ;;  %v188_v15 = vld [vmem:[%s1542_s3 + $0x8] sm:$0xff]  ;;  %v189_v16 = vld [vmem:[%s1542_s3 + $0x10] sm:$0xff]  ;;  %v190_v17 = vld [vmem:[%s1542_s3 + $0x18] sm:$0xff] }
  0x1d   :  { %346 = vperm.xlu1 %1182, %v328_v29   ;;  %v321_v18 = vld [vmem:[%s1544_s5] sm:$0xff] }
  0x1f   :  { %1123 = vmatpush3.bf16.xpose.msra.mxu0 %v1120_v21  ;;  %466 = vperm.xlu0 %1181, %v459_v30  }
  0x20   :  { %1125 = vmatprep.subr.bf16.mxu0 %v1124_v28 }
  0x21   :  { %471 = vperm.xlu1 %1182, %v460_v31  }
  0x23   :  { %476 = vperm.xlu0 %1181, %v461_v34  }
  0x25   :  { %624 = vperm.xlu1 %1182, %v618_v36  }
  0x27   :  { %1127 = vmatpush3.bf16.xpose.msra.mxu0 %v1124_v28  ;;  %628 = vperm.xlu0 %1181, %v619_v37  }
  0x28   :  { %1129 = vmatprep.subr.bf16.mxu0 %v1128_v35 }
  0x29   :  { %632 = vperm.xlu1 %1182, %v620_v38  }
  0x2b   :  { %481 = vperm.xlu0 %1181, %v462_v41   ;;  %v322_v41 = vld [vmem:[%s1544_s5 + $0x8] sm:$0xff] }
  0x2d   :  { %486 = vperm.xlu1 %1182, %v463_v43   ;;  %v324_v43 = vld [vmem:[%s1544_s5 + $0x18] sm:$0xff] }
  0x2f   :  { %1131 = vmatpush3.bf16.xpose.msra.mxu0 %v1128_v35  ;;  %636 = vperm.xlu0 %1181, %v621_v44   ;;  %v1212_v44 = vmov 0.0|0.0  }
  0x30   :  { %1133 = vmatprep.subr.bf16.mxu0 %v1132_v42 }
  0x31   :  { %676 = vperm.xlu1 %1182, %v670_v45   ;;  %v1214_v45 = vmov 0.0  }
  0x33   :  { %681 = vperm.xlu0 %1181, %v671_v48  }
  0x35   :  { %686 = vperm.xlu1 %1182, %v672_v50  }
  0x37   :  { %1135 = vmatpush3.bf16.xpose.msra.mxu0 %v1132_v42  ;;  %691 = vperm.xlu0 %1181, %v673_v51   ;;  %v323_v42 = vld [vmem:[%s1544_s5 + $0x10] sm:$0xff] }
  0x38   :  { %1137 = vmatprep.subr.bf16.mxu0 %v1136_v49 }
  0x39   :  { %822 = vperm.xlu1 %1182, %v819_v52  }
  0x3f   :  { %1139 = vmatpush3.bf16.xpose.msra.mxu0 %v1136_v49 }
  0x46   :  { %1027 = vmatmul.mubr.f32.vlgmr.msra.gmra.mrb[0].mxu0 %v67_v53 }
  0x47   :  { %1029 = vmatprep.mubr.f32.mxu0 %v68_v54 }
  0x4a   :  { %1030 = vmatmul.mubr.f32.gmra.mrb[2].mxu0 %v69_v55 }
  0x85   :  { %v87_v58 = vpop.permute.xlu1 %86 }
  0x86   :  { %v77_v57 = vpop.permute.xlu0 %76 }
  0x89   :  { %v92_v1 = vpop.permute.xlu1 %91 }
  0x8a   :  { %v82_v59 = vpop.permute.xlu0 %81 }
  0x8e   :  { %v198_v20 = vpop.permute.xlu0 %197 }
  0x90   :  { %v203_v19 = vpop.permute.xlu1 %202 }
  0x92   :  { %v208_v29 = vpop.permute.xlu0 %207 }
  0x94   :  { %v213_v26 = vpop.permute.xlu1 %212 }
  0x96   :  { %v332_v47 = vpop.permute.xlu0 %331 }
  0x98   :  { %v337_v46 = vpop.permute.xlu1 %336 }
  0x9a   :  { %v342_v56 = vpop.permute.xlu0 %341 }
  0x9c   :  { %v347_v53 = vpop.permute.xlu1 %346 }
 0x119   :  { %v1028_v60 = vpop.f32.mrb[0].mxu0 }
 0x11a   :  { %v166_v61 = vadd.f32 %v1028_v60, %v82_v59  ;;  %v160_v62 = vpop.f32.mrb[1].mxu0 }
 0x11b   :  { %v161_v63 = vadd.f32 %v160_v62, %v77_v57 }
 0x11c   :  { %v180_v0 = vmul.f32 0.01, %v166_v61 }
 0x11d   :  { %v179_v2 = vmul.f32 0.01, %v161_v63  ;;  %v1031_v3 = vpop.f32.mrb[2].mxu0 }
 0x11e   :  { %v184_v4 = vmax.f32 %v166_v61, %v180_v0  ;;  %v176_v5 = vadd.f32 %v1031_v3, %v92_v1  ;;  %v170_v6 = vpop.f32.mrb[3].mxu0 }
 0x11f   :  { %v183_v7 = vmax.f32 %v161_v63, %v179_v2  ;;  %v171_v8 = vadd.f32 %v170_v6, %v87_v58  ;;  %v456_v6 = vld [vmem:[%s1546_s7 + $0x10] sm:$0xff] }
 0x120   :  { %v182_v9 = vmul.f32 0.01, %v176_v5 }
 0x121   :  { %v181_v10 = vmul.f32 0.01, %v171_v8  ;;  %v1140_v11 = vpack.c.bf16 %v184_v4, %v183_v7  ;;  %v454_v4 = vld [vmem:[%s1546_s7] sm:$0xff]  ;;  %v457_v7 = vld [vmem:[%s1546_s7 + $0x18] sm:$0xff] }
 0x122   :  { %v186_v12 = vmax.f32 %v176_v5, %v182_v9  ;;  %v455_v5 = vld [vmem:[%s1546_s7 + $0x8] sm:$0xff]  ;;  %v666_v9 = vld [vmem:[%s1549_s10] sm:$0xff] }
 0x123   :  { %v185_v13 = vmax.f32 %v171_v8, %v181_v10  ;;  %1141 = vmatprep.subr.bf16.mxu1 %v1140_v11  ;;  %v458_v8 = vld [vmem:[%s1546_s7 + $0x20] sm:$0x7]  ;;  %v467_v10 = vpop.permute.xlu0 %466 }
 0x124   :  { %1143 = vmatpush3.bf16.msra.mxu1 %v1140_v11 }
 0x125   :  { %v1144_v14 = vpack.c.bf16 %v186_v12, %v185_v13 }
 0x127   :  { %1145 = vmatprep.subr.bf16.mxu1 %v1144_v14 }
 0x128   :  { %1147 = vmatpush3.bf16.msra.mxu1 %v1144_v14 }
 0x12b   :  { %1041 = vmatmul.mubr.msk.f32.vlgmr.msra.gmra.mrb[0].mxu1 %vm215_vm0, %v188_v15 }
 0x12c   :  { %1043 = vmatprep.mubr.msk.f32.mxu1 %vm215_vm0, %v189_v16 }
 0x12f   :  { %1044 = vmatmul.mubr.msk.f32.gmra.mrb[2].mxu1 %vm215_vm0, %v190_v17 }
 0x130   :  { %1054 = vmatprep.mubr.msk.f32.mxu1 %vm215_vm0, %v321_v18 }
 0x1fe   :  { %v1042_v21 = vpop.f32.mrb[0].mxu1 }
 0x1ff   :  { %v300_v22 = vadd.f32 %v1042_v21, %v203_v19  ;;  %v294_v23 = vpop.f32.mrb[1].mxu1  ;;  %v477_v19 = vpop.permute.xlu0 %476 }
 0x200   :  { %v295_v24 = vadd.f32 %v294_v23, %v198_v20  ;;  %v472_v21 = vpop.permute.xlu1 %471 }
 0x201   :  { %v314_v25 = vmul.f32 0.01, %v300_v22 }
 0x202   :  { %v313_v27 = vmul.f32 0.01, %v295_v24  ;;  %v1045_v28 = vpop.f32.mrb[2].mxu1 }
 0x203   :  { %v318_v30 = vmax.f32 %v300_v22, %v314_v25  ;;  %v310_v31 = vadd.f32 %v1045_v28, %v213_v26  ;;  %v304_v32 = vpop.f32.mrb[3].mxu1  ;;  %v629_v25 = vpop.permute.xlu0 %628 }
 0x204   :  { %v317_v33 = vmax.f32 %v295_v24, %v313_v27  ;;  %v305_v34 = vadd.f32 %v304_v32, %v208_v29  ;;  %v625_v28 = vpop.permute.xlu1 %624 }
 0x205   :  { %v316_v35 = vmul.f32 0.01, %v310_v31 }
 0x206   :  { %v315_v36 = vmul.f32 0.01, %v305_v34  ;;  %v1148_v37 = vpack.c.bf16 %v318_v30, %v317_v33  ;;  %v609_v30 = vlaneseq }
 0x207   :  { %v320_v38 = vmax.f32 %v310_v31, %v316_v35  ;;  %v482_v33 = vpop.permute.xlu0 %481 }
 0x208   :  { %v319_v39 = vmax.f32 %v305_v34, %v315_v36  ;;  %1149 = vmatprep.subr.bf16.mxu1 %v1148_v37  ;;  %v633_v35 = vpop.permute.xlu1 %632  ;;  %v1497_v36 = vshrl.u32 %v609_v30, 7 }
 0x209   :  { %1151 = vmatpush3.bf16.msra.mxu1 %v1148_v37 }
 0x20a   :  { %v1152_v40 = vpack.c.bf16 %v320_v38, %v319_v39 }
 0x20c   :  { %1153 = vmatprep.subr.bf16.mxu1 %v1152_v40 }
 0x20d   :  { %1155 = vmatpush3.bf16.msra.mxu1 %v1152_v40  ;;  %v637_v40 = vpop.permute.xlu0 %636 }
 0x20e   :  { %1156 = vmatprep.subr.bf16.mxu1 %v1212_v44 }
 0x210   :  { %1055 = vmatmul.mubr.msk.f32.vlgmr.msra.gmra.mrb[4].mxu1 %vm215_vm0, %v322_v41  ;;  %v611_v41 = vsub.s32 0, %v1497_v36 }
 0x211   :  { %1057 = vmatprep.mubr.msk.f32.mxu1 %vm215_vm0, %v323_v42 }
 0x214   :  { %1058 = vmatmul.mubr.msk.f32.gmra.mrb[6].mxu1 %vm215_vm0, %v324_v43  ;;  %v639_v43 = vrot.slane %v625_v28, 5  ;;  %v682_v28 = vpop.permute.xlu0 %681 }
 0x215   :  { %1068 = vmatprep.mubr.msk.f32.mxu1 %vm1213_vm1, %v1214_v45 }
 0x2e3   :  { %v1056_v48 = vpop.f32.mrb[4].mxu1 }
 0x2e4   :  { %v433_v49 = vadd.f32 %v1056_v48, %v337_v46  ;;  %v427_v50 = vpop.f32.mrb[5].mxu1  ;;  %v640_v46 = vrot.slane %v629_v25, 5  ;;  %v644_v48 = vrot.slane %v637_v40, 5  ;;  %v667_v25 = vld [vmem:[%s1549_s10 + $0x8] sm:$0xff] }
 0x2e5   :  { %v428_v51 = vadd.f32 %v427_v50, %v332_v47  ;;  %v642_v47 = vrot.slane %v633_v35, 5  ;;  %v692_v35 = vpop.permute.xlu0 %691 }
 0x2e6   :  { %v447_v52 = vmul.f32 0.01, %v433_v49 }
 0x2e7   :  { %v446_v54 = vmul.f32 0.01, %v428_v51  ;;  %v1059_v55 = vpop.f32.mrb[6].mxu1 }
 0x2e8   :  { %v451_v57 = vmax.f32 %v433_v49, %v447_v52  ;;  %v443_v58 = vadd.f32 %v1059_v55, %v347_v53  ;;  %v437_v59 = vpop.f32.mrb[7].mxu1  ;;  %v487_v49 = vpop.permute.xlu1 %486 }
 0x2e9   :  { %v450_v60 = vmax.f32 %v428_v51, %v446_v54  ;;  %v438_v61 = vadd.f32 %v437_v59, %v342_v56  ;;  %v641_v59 = vsel %vm638_vm2, %v639_v43, %v640_v46 }
 0x2ea   :  { %v449_v62 = vmul.f32 0.01, %v443_v58 }
 0x2eb   :  { %v1157_v63 = vpack.c.bf16 %v451_v57, %v450_v60  ;;  %v448_v0 = vmul.f32 0.01, %v438_v61  ;;  %v643_v60 = vsel %vm638_vm2, %v640_v46, %v642_v47 }
 0x2ec   :  { %v453_v1 = vmax.f32 %v443_v58, %v449_v62 }
 0x2ed   :  { %v452_v2 = vmax.f32 %v438_v61, %v448_v0  ;;  %1158 = vmatpush3.bf16.msra.mxu1 %v1157_v63  ;;  %v645_v61 = vsel %vm638_vm2, %v642_v47, %v644_v48 }
 0x2ee   :  { %1159 = vmatprep.subr.bf16.mxu1 %v1212_v44 }
 0x2ef   :  { %v1160_v3 = vpack.c.bf16 %v453_v1, %v452_v2 }
 0x2f1   :  { %1161 = vmatpush3.bf16.msra.mxu1 %v1160_v3 }
 0x2f4   :  { %1069 = vmatmul.mubr.msk.f32.vlgmr.msra.gmra.mrb[8].mxu1 %vm215_vm0, %v454_v4 }
 0x2f5   :  { %1071 = vmatprep.mubr.msk.f32.mxu1 %vm1213_vm1, %v1214_v45 }
 0x2f8   :  { %1072 = vmatmul.mubr.msk.f32.gmra.mrb[10].mxu1 %vm215_vm0, %v455_v5 }
 0x2f9   :  { %1074 = vmatprep.mubr.msk.f32.mxu1 %vm1213_vm1, %v1214_v45 }
 0x2fc   :  { %1075 = vmatmul.mubr.msk.f32.gmra.mrb[12].mxu1 %vm215_vm0, %v456_v6 }
 0x2fd   :  { %1077 = vmatprep.mubr.msk.f32.mxu1 %vm1213_vm1, %v1214_v45 }
 0x300   :  { %1078 = vmatmul.mubr.msk.f32.gmra.mrb[14].mxu1 %vm215_vm0, %v457_v7 }
 0x301   :  { %1080 = vmatprep.mubr.msk.f32.mxu1 %vm1213_vm1, %v1214_v45 }
 0x304   :  { %1081 = vmatmul.mubr.msk.f32.gmra.mrb[16].mxu1 %vm215_vm0, %v458_v8 }
 0x305   :  { %1091 = vmatprep.mubr.msk.f32.mxu1 %vm215_vm0, %v666_v9 }
 0x3c7   :  { %v570_v11 = vpop.f32.mrb[8].mxu1 }
 0x3c8   :  { %v571_v12 = vadd.f32 %v570_v11, %v467_v10  ;;  %v1070_v13 = vpop.f32.mrb[9].mxu1 }
 0x3ca   :  { %v594_v14 = vmul.f32 0.5, %v571_v12  ;;  %v598_v15 = vmul.f32 %v571_v12, %v571_v12 }
 0x3cb   :  { %v575_v16 = vpop.f32.mrb[10].mxu1 }
 0x3cc   :  { %1183 = vtanh.f32 %v594_v14  ;;  %v600_v17 = vrot.slane %v598_v15, 1  ;;  %v1073_v18 = vpop.f32.mrb[11].mxu1  ;;  %v576_v51 = vadd.f32 %v575_v16, %v472_v21 }
 0x3ce   :  { %v602_v20 = vadd.f32 %v600_v17, %v598_v15 }
 0x3cf   :  { %v580_v22 = vpop.f32.mrb[12].mxu1 }
 0x3d0   :  { %v603_v23 = vmax.f32 %v602_v20, 1e-10  ;;  %v1076_v24 = vpop.f32.mrb[13].mxu1  ;;  %v581_v52 = vadd.f32 %v580_v22, %v477_v19 }
 0x3d2   :  { %1185 = vrsqrt.f32 %v603_v23 }
 0x3d3   :  { %v585_v26 = vpop.f32.mrb[14].mxu1 }
 0x3d4   :  { %v1079_v27 = vpop.f32.mrb[15].mxu1  ;;  %v586_v53 = vadd.f32 %v585_v26, %v482_v33  ;;  %v668_v26 = vld [vmem:[%s1549_s10 + $0x10] sm:$0xff] }
 0x3d5   :  { %v669_v27 = vld [vmem:[%s1549_s10 + $0x18] sm:$0xff] }
 0x3d6   :  { %v1184_v29 = vpop.eup %1183 }
 0x3d7   :  { %v590_v31 = vpop.f32.mrb[16].mxu1  ;;  %v596_v34 = vadd.f32 1.0, %v1184_v29  ;;  %v677_v29 = vpop.permute.xlu1 %676 }
 0x3d8   :  { %v1082_v32 = vpop.f32.mrb[17].mxu1  ;;  %v591_v54 = vadd.f32 %v590_v31, %v487_v49 }
 0x3d9   :  { %v597_v38 = vmul.f32 0.5, %v596_v34 }
 0x3dc   :  { %v1186_v37 = vpop.eup %1185 }
 0x3dd   :  { %v606_v39 = vrot.slane %v1186_v37, 1 }
 0x3df   :  { %v608_v42 = vmul.f32 %v606_v39, %v597_v38  ;;  %v687_v39 = vpop.permute.xlu1 %686 }
 0x3e1   :  { %v612_v50 = vrot.slane %v608_v42, %v611_v41 }
 0x3e3   :  { %v613_v55 = vmul.f32 %v612_v50, %v571_v12  ;;  %v614_v56 = vmul.f32 %v612_v50, %v576_v51  ;;  %v615_v57 = vmul.f32 %v612_v50, %v581_v52  ;;  %v616_v58 = vmul.f32 %v612_v50, %v586_v53  ;;  %v818_v53 = vld [vmem:[%s1551_s12] sm:$0x1] }
 0x3e4   :  { %v617_v62 = vmul.f32 %v612_v50, %v591_v54  ;;  %v823_v54 = vpop.permute.xlu1 %822 }
 0x3e5   :  { %v651_v63 = vadd.f32 %v639_v43, %v613_v55  ;;  %902 = vst [vmem:[#allocation3 - $0x1] sm:$0x6] %v613_v55  ;;  %v652_v0 = vadd.f32 %v641_v59, %v614_v56  ;;  %v653_v1 = vadd.f32 %v643_v60, %v615_v57  ;;  %v654_v2 = vadd.f32 %v645_v61, %v616_v58 }
 0x3e6   :  { %v655_v3 = vadd.f32 %v644_v48, %v617_v62  ;;  %v828_v55 = vrot.slane %v823_v54, %v611_v41 }
 0x3e7   :  { %v656_v4 = vmul.f32 0.01, %v651_v63  ;;  %v657_v5 = vmul.f32 0.01, %v652_v0  ;;  %v658_v6 = vmul.f32 0.01, %v653_v1 }
 0x3e8   :  { %v659_v7 = vmul.f32 0.01, %v654_v2  ;;  %v660_v8 = vmul.f32 0.01, %v655_v3 }
 0x3e9   :  { %v661_v9 = vmax.f32 %v651_v63, %v656_v4  ;;  %v662_v10 = vmax.f32 %v652_v0, %v657_v5  ;;  %v663_v11 = vmax.f32 %v653_v1, %v658_v6 }
 0x3ea   :  { %v664_v12 = vmax.f32 %v654_v2, %v659_v7  ;;  %v665_v13 = vmax.f32 %v655_v3, %v660_v8 }
 0x3eb   :  { %v701_v14 = vrot.slane %v662_v10, 3  ;;  %v703_v15 = vrot.slane %v663_v11, 3  ;;  %v700_v16 = vrot.slane %v661_v9, 3 }
 0x3ec   :  { %v705_v17 = vrot.slane %v664_v12, 3  ;;  %v707_v18 = vrot.slane %v665_v13, 3 }
 0x3ed   :  { %v702_v19 = vsel %vm699_vm3, %v700_v16, %v701_v14  ;;  %v704_v20 = vsel %vm699_vm3, %v701_v14, %v703_v15 }
 0x3ee   :  { %v1162_v21 = vpack.c.bf16 %v704_v20, %v702_v19  ;;  %v706_v22 = vsel %vm699_vm3, %v703_v15, %v705_v17  ;;  %v708_v23 = vsel %vm699_vm3, %v705_v17, %v707_v18 }
 0x3ef   :  { %v1166_v24 = vpack.c.bf16 %v708_v23, %v706_v22 }
 0x3f0   :  { %1163 = vmatprep.subr.bf16.mxu1 %v1162_v21 }
 0x3f1   :  { %1165 = vmatpush3.bf16.msra.mxu1 %v1162_v21 }
 0x3f2   :  { %1167 = vmatprep.subr.bf16.mxu1 %v1166_v24 }
 0x3f5   :  { %1169 = vmatpush3.bf16.msra.mxu1 %v1166_v24 }
 0x3f6   :  { %1170 = vmatprep.subr.bf16.mxu1 %v1212_v44 }
 0x3f8   :  { %1092 = vmatmul.mubr.msk.f32.vlgmr.msra.gmra.mrb[18].mxu1 %vm215_vm0, %v667_v25 }
 0x3f9   :  { %1094 = vmatprep.mubr.msk.f32.mxu1 %vm215_vm0, %v668_v26 }
 0x3fc   :  { %1095 = vmatmul.mubr.msk.f32.gmra.mrb[20].mxu1 %vm215_vm0, %v669_v27 }
 0x3fd   :  { %1105 = vmatprep.mubr.msk.f32.mxu1 %vm1213_vm1, %v1214_v45 }
 0x4cb   :  { %v1093_v30 = vpop.f32.mrb[18].mxu1 }
 0x4cc   :  { %v797_v31 = vadd.f32 %v1093_v30, %v682_v28  ;;  %v791_v32 = vpop.f32.mrb[19].mxu1 }
 0x4cd   :  { %v792_v33 = vadd.f32 %v791_v32, %v677_v29 }
 0x4ce   :  { %v811_v34 = vmul.f32 0.01, %v797_v31 }
 0x4cf   :  { %v810_v37 = vmul.f32 0.01, %v792_v33  ;;  %v1096_v38 = vpop.f32.mrb[20].mxu1 }
 0x4d0   :  { %v815_v40 = vmax.f32 %v797_v31, %v811_v34  ;;  %v807_v42 = vadd.f32 %v1096_v38, %v692_v35  ;;  %v801_v43 = vpop.f32.mrb[21].mxu1 }
 0x4d1   :  { %v814_v46 = vmax.f32 %v792_v33, %v810_v37  ;;  %v802_v47 = vadd.f32 %v801_v43, %v687_v39 }
 0x4d2   :  { %v813_v48 = vmul.f32 0.01, %v807_v42 }
 0x4d3   :  { %v1171_v49 = vpack.c.bf16 %v815_v40, %v814_v46  ;;  %v812_v50 = vmul.f32 0.01, %v802_v47 }
 0x4d4   :  { %v817_v45 = vmax.f32 %v807_v42, %v813_v48 }
 0x4d5   :  { %v816_v51 = vmax.f32 %v802_v47, %v812_v50  ;;  %1172 = vmatpush3.bf16.msra.mxu1 %v1171_v49 }
 0x4d6   :  { %1173 = vmatprep.subr.bf16.mxu1 %v1212_v44 }
 0x4d7   :  { %v1174_v52 = vpack.c.bf16 %v817_v45, %v816_v51 }
 0x4d9   :  { %1175 = vmatpush3.bf16.msra.mxu1 %v1174_v52 }
 0x4dc   :  { %1106 = vmatmul.mubr.msk.f32.vlgmr.msra.gmra.mrb[22].mxu1 %vm215_vm0, %v818_v53 }
 0x5af   :  { %v898_v56 = vpop.f32.mrb[22].mxu1 }
 0x5b0   :  { %v899_v57 = vadd.f32 %v898_v56, %v828_v55  ;;  %v1107_v58 = vpop.f32.mrb[23].mxu1 }
 0x5b2   :  { %903 = vst [vmem:[#allocation3 + $0x2] sm:$0x1] %v899_v57 }
 0x5b3   :  { %1198 = shalt.err (!%p1195_p4)
}
 0x5b4   :  { %s1199_s15 = scalar_lea.hbm %s1553_s14, 64 }
 0x5b5   :  { %p1200_p5 = scmp.ne.s32.totalorder %s1553_s14, %s1199_s15  ;;  %p1203_p6 = scmp.lt.u32.totalorder %s1199_s15, %s1553_s14 }
 0x5b7   :  { %p1205_p7 = pnand %p1203_p6, %p1200_p5 }
 0x5b9   :  { %1208 = shalt.err (!%p1205_p7)
}
 0x5ba   :  { %913 = dma.vmem_to_hbm [thread:$0]  %s911_s30, 64, %s1553_s14, [#allocation4]  }
 0x5bb   :  { %1209 = dma.done.wait [#allocation4], 64  }
 0x5bc   :  { %1210 = vsyncadd [#allocation4], 4294967232 }
 0x5bd   :  { %917 = vsyncpa [#allocation4], 1 }

</bundles_post_ra>
